<compile_context>
chip_gen: v5e
topology: v5e:2x2
jax: 0.10.0
libtpu: 0.0.40
codegen_flags: <defaults>
</compile_context>

<pallas_src>
import functools
import math

import jax
import jax.numpy as jnp
from jax.experimental import pallas as pl
from jax.experimental.pallas import tpu as pltpu


_N_CORES = 2                            # leading "parallel" axis (v7x megacore)
_REDUCE_BLOCK_BYTES = 8 * 1024 * 1024   # single-stream reduction passes
_ELEMWISE_BLOCK_BYTES = 4 * 1024 * 1024  # 3-stream elementwise pass (per stream)
_VMEM_LIMIT = 32 * 1024 * 1024          # scoped-VMEM budget, safe on v5e/v6e/v7x

_SMEM_SPEC = pl.BlockSpec(memory_space=pltpu.MemorySpace.SMEM)


def _round_up(a, b):
    return (a + b - 1) // b * b


def _sublane_multiple(dtype):
    # 8 rows per sublane-tile for 4-byte, 16 for 2-byte, 32 for 1-byte dtypes.
    return max(8, 32 // jnp.dtype(dtype).itemsize)


def _pick_tile_rows(n_rows, n_cols, sub, target_elems):
    cap = max(sub, (max(target_elems, sub * n_cols) // max(n_cols, 1)) // sub * sub)
    return max(sub, min(_round_up(n_rows, sub), cap))


def _activation(x, task):
    if task == "binary":
        return jax.nn.sigmoid(x)
    # numerically stable softmax over the last (lane) dim
    m = jnp.max(x, axis=-1, keepdims=True)
    e = jnp.exp(x - m)
    return e * pl.reciprocal(jnp.sum(e, axis=-1, keepdims=True), approx=False)


def _fold_rows(v, tile_r, n_cols):
    # (tile_r, n_cols) -> (8, n_cols) with pure VPU adds (layout-preserving
    # reshape that only groups rows); the cross-lane reduce happens once,
    # outside the kernel, on the tiny (cores, 8, n_cols) partials.
    return jnp.sum(v.reshape(tile_r // 8, 8, n_cols), axis=0)


def _accumulate(out_refs, values, *, c, i, tile_r, n_cols, n_rows, inner,
                may_mask):
    """Accumulate row-folded `values` into resident (8, n_cols) out blocks."""

    def add(mask):
        for ref, val in zip(out_refs, values):
            if mask is not None:
                val = jnp.where(mask, val, 0.0)
            ref[...] += _fold_rows(val, tile_r, n_cols)

    if not may_mask:            # static: rows divide evenly, no duplicate blocks
        add(None)
        return

    gb = c * inner + i                          # global (unclamped) block index
    tail = (gb + 1) * tile_r > n_rows           # only the tail/duplicate blocks

    @pl.when(jnp.logical_not(tail))
    def _():
        add(None)

    @pl.when(tail)
    def _():
        rows = jax.lax.broadcasted_iota(jnp.int32, (tile_r, 1), 0) + gb * tile_r
        add(rows < n_rows)


# ---------------------------------------------------------------------------
# Pass 1: partial sums of act (and act**3 when needed).
# ---------------------------------------------------------------------------
def _partial_sums_kernel(x_ref, *out_refs, task, tile_r, n_cols, n_rows, inner,
                         need_cube, may_mask):
    c = pl.program_id(0)
    i = pl.program_id(1)

    @pl.when(i == 0)
    def _():
        for ref in out_refs:
            ref[...] = jnp.zeros_like(ref)

    x = x_ref[...].astype(jnp.float32)
    act = _activation(x, task)
    values = [act]
    if need_cube:
        values.append(act * act * act)          # VPU multiplies, not pow()
    _accumulate(out_refs, values, c=c, i=i, tile_r=tile_r, n_cols=n_cols,
                n_rows=n_rows, inner=inner, may_mask=may_mask)


# ---------------------------------------------------------------------------
# Pass 2a (reduction='mean', full-shape target): sum of sqrt(|t|*scale + eps).
# Never re-reads x. |3.985*t/denom| == |t|*scale because denom > 0.
# ---------------------------------------------------------------------------
def _sqrt_sum_kernel(params_ref, t_ref, out_ref, *, eps, tile_r, n_cols,
                     n_rows, inner, may_mask):
    c = pl.program_id(0)
    i = pl.program_id(1)

    @pl.when(i == 0)
    def _():
        out_ref[...] = jnp.zeros_like(out_ref)

    scale = params_ref[0]                       # hoisted 3.985 / denom
    t = t_ref[...].astype(jnp.float32)
    term = jnp.sqrt(jnp.abs(t) * scale + eps)
    _accumulate((out_ref,), (term,), c=c, i=i, tile_r=tile_r, n_cols=n_cols,
                n_rows=n_rows, inner=inner, may_mask=may_mask)


# ---------------------------------------------------------------------------
# Pass 2b (reduction='none'): elementwise loss tiles (OOB tail writes are
# clipped by Pallas, so no masking needed).
# ---------------------------------------------------------------------------
def _loss_none_kernel(params_ref, x_ref, *rest, task, eps, has_full_t):
    if has_full_t:
        t_ref, out_ref = rest
    else:
        (out_ref,) = rest

    x = x_ref[...].astype(jnp.float32)
    act = _activation(x, task)
    cube = act * act * act
    if has_full_t:
        scale = params_ref[0]
        t = t_ref[...].astype(jnp.float32)
        out_ref[...] = cube + jnp.sqrt(jnp.abs(t) * scale + eps)
    else:
        # scalar GAN label: sqrt(|t|*scale + eps) is a precomputed SMEM scalar
        out_ref[...] = cube + params_ref[0]


def _reduce_call(kernel, operands, in_specs, *, n_out, n_cols, n_cores, inner):
    acc_spec = pl.BlockSpec((None, 8, n_cols), lambda c, i: (c, 0, 0))
    outs = pl.pallas_call(
        kernel,
        out_shape=tuple(jax.ShapeDtypeStruct((n_cores, 8, n_cols), jnp.float32)
                        for _ in range(n_out)),
        grid=(n_cores, inner),
        in_specs=in_specs,
        out_specs=tuple(acc_spec for _ in range(n_out)),
        compiler_params=pltpu.CompilerParams(
            dimension_semantics=("parallel", "arbitrary"),
            vmem_limit_bytes=_VMEM_LIMIT),
    )(*operands)
    return tuple(jnp.sum(o) for o in outs)


def _reduce_geometry(n_rows, tile_r):
    num_blocks = max(1, -(-n_rows // tile_r))
    n_cores = min(_N_CORES, num_blocks)
    inner = -(-num_blocks // n_cores)
    may_mask = n_rows < n_cores * inner * tile_r
    # Clamp in the index map so duplicate blocks (odd block counts) stay
    # in-bounds; their contribution is zeroed by the in-kernel row mask.
    index_map = lambda c, i: (jnp.minimum(c * inner + i, num_blocks - 1), 0)
    return num_blocks, n_cores, inner, may_mask, index_map


def _as_rows(t, orig_shape, n_rows, n_cols):
    if tuple(t.shape) != tuple(orig_shape):
        # TODO(synk): broadcastable (per-row / per-channel) targets are
        # materialized full-size here; a per-row SMEM/block path would avoid it.
        t = jnp.broadcast_to(t, orig_shape)
    return t.reshape(n_rows, n_cols)            # zero-copy view


def ganetic_loss(x, target, *, eps=1e-7, task="binary", reduction="mean"):
    """Pallas TPU implementation of GANetic.forward(x, target)."""
    eps = float(eps)
    orig_shape = x.shape
    total = int(math.prod(orig_shape)) if orig_shape else 1
    target = jnp.asarray(target)
    scalar_target = target.size == 1

    if task == "binary":
        # elementwise activation: free to pick a lane-dense width that divides
        # the element count so the flat reshape stays a zero-copy view
        n_cols = None
        for cand in (512, 256, 128):
            if total % cand == 0:
                n_cols = cand
                break
        if n_cols is None:
            n_cols = int(orig_shape[-1]) if orig_shape else 1
    else:
        # softmax axis must stay the lane dim
        # TODO(synk): for class counts < 128 the lane dim is under-utilized;
        # packing several rows per 128-lane vreg needs a segmented softmax.
        n_cols = int(orig_shape[-1])
    n_rows = total // n_cols

    x2 = x.reshape(n_rows, n_cols)              # zero-copy view, no padding

    # ---- pass 1: global sums of act (and act**3 if needed) -----------------
    need_cube = reduction == "mean"
    sub = _sublane_multiple(x.dtype)
    itemsize = jnp.dtype(x.dtype).itemsize
    tile_r = _pick_tile_rows(n_rows, n_cols, sub, _REDUCE_BLOCK_BYTES // itemsize)
    _, n_cores, inner, may_mask, x_map = _reduce_geometry(n_rows, tile_r)

    sums = _reduce_call(
        functools.partial(_partial_sums_kernel, task=task, tile_r=tile_r,
                          n_cols=n_cols, n_rows=n_rows, inner=inner,
                          need_cube=need_cube, may_mask=may_mask),
        (x2,), [pl.BlockSpec((tile_r, n_cols), x_map)],
        n_out=2 if need_cube else 1, n_cols=n_cols, n_cores=n_cores,
        inner=inner)
    sum_act = sums[0]
    sum_cube = sums[1] if need_cube else None

    denom = sum_act + eps * total               # == torch.sum(act + eps) > 0
    scale = 3.985 / denom                       # hoisted scalar reciprocal

    # ---- pass 2 -------------------------------------------------------------
    if reduction == "mean":
        if scalar_target:
            t_abs = jnp.abs(target.reshape(()).astype(jnp.float32))
            return sum_cube / total + jnp.sqrt(t_abs * scale + eps)

        t2 = _as_rows(target, orig_shape, n_rows, n_cols)
        t_sub = _sublane_multiple(t2.dtype)
        t_item = jnp.dtype(t2.dtype).itemsize
        t_tile = _pick_tile_rows(n_rows, n_cols, t_sub,
                                 _REDUCE_BLOCK_BYTES // t_item)
        _, t_cores, t_inner, t_mask, t_map = _reduce_geometry(n_rows, t_tile)
        params = jnp.reshape(scale, (1,)).astype(jnp.float32)
        (sum_sqrt,) = _reduce_call(
            functools.partial(_sqrt_sum_kernel, eps=eps, tile_r=t_tile,
                              n_cols=n_cols, n_rows=n_rows, inner=t_inner,
                              may_mask=t_mask),
            (params, t2),
            [_SMEM_SPEC, pl.BlockSpec((t_tile, n_cols), t_map)],
            n_out=1, n_cols=n_cols, n_cores=t_cores, inner=t_inner)
        return (sum_cube + sum_sqrt) / total

    # reduction == 'none'
    tile_e = _pick_tile_rows(n_rows, n_cols, sub, _ELEMWISE_BLOCK_BYTES // 4)
    e_blocks = max(1, -(-n_rows // tile_e))
    e_block = pl.BlockSpec((tile_e, n_cols), lambda i: (i, 0))

    if scalar_target:
        t_abs = jnp.abs(target.reshape(()).astype(jnp.float32))
        sqrt_const = jnp.sqrt(t_abs * scale + eps)
        params = jnp.reshape(sqrt_const, (1,)).astype(jnp.float32)
        operands = (params, x2)
        in_specs = [_SMEM_SPEC, e_block]
        has_full_t = False
    else:
        params = jnp.reshape(scale, (1,)).astype(jnp.float32)
        operands = (params, x2, _as_rows(target, orig_shape, n_rows, n_cols))
        in_specs = [_SMEM_SPEC, e_block, e_block]
        has_full_t = True

    out = pl.pallas_call(
        functools.partial(_loss_none_kernel, task=task, eps=eps,
                          has_full_t=has_full_t),
        out_shape=jax.ShapeDtypeStruct((n_rows, n_cols), jnp.float32),
        grid=(e_blocks,),
        in_specs=in_specs,
        out_specs=e_block,
        compiler_params=pltpu.CompilerParams(
            dimension_semantics=("parallel",),
            vmem_limit_bytes=_VMEM_LIMIT),
    )(*operands)
    return out.reshape(orig_shape)              # zero-copy: no slice needed


def _reference(x, target, *, eps, task, reduction):
    x = x.astype(jnp.float32)
    t = jnp.broadcast_to(jnp.asarray(target, jnp.float32), x.shape)
    a = jax.nn.sigmoid(x) if task == "binary" else jax.nn.softmax(x, axis=-1)
    loss = a ** 3.0 + jnp.sqrt(jnp.abs(3.985 * t / jnp.sum(a + eps)) + eps)
    return jnp.mean(loss) if reduction == "mean" else loss


if __name__ == "__main__":
    key = jax.random.PRNGKey(0)
    kx, kt = jax.random.split(key)

    # small NCHW-style input, consistent with a GAN discriminator output map
    x = jax.random.normal(kx, (2, 4, 16, 16), dtype=jnp.float32)
    target = jax.random.uniform(kt, (2, 4, 16, 16), dtype=jnp.float32)
    eps = 1e-7

    # task='binary', reduction='mean', full-shape target
    out = jax.block_until_ready(
        ganetic_loss(x, target, eps=eps, task="binary", reduction="mean"))
    ref = _reference(x, target, eps=eps, task="binary", reduction="mean")
    assert jnp.allclose(out, ref, rtol=1e-4, atol=1e-5), (out, ref)

    # task='multi' (softmax over dim=-1), reduction='none', full-shape target
    out = jax.block_until_ready(
        ganetic_loss(x, target, eps=eps, task="multi", reduction="none"))
    ref = _reference(x, target, eps=eps, task="multi", reduction="none")
    assert out.shape == x.shape
    assert jnp.allclose(out, ref, rtol=1e-4, atol=1e-5)

    # scalar "real" label (no full-size broadcast through HBM)
    out = jax.block_until_ready(
        ganetic_loss(x, 1.0, eps=eps, task="binary", reduction="mean"))
    ref = _reference(x, jnp.float32(1.0), eps=eps, task="binary", reduction="mean")
    assert jnp.allclose(out, ref, rtol=1e-4, atol=1e-5), (out, ref)

    out = jax.block_until_ready(
        ganetic_loss(x, 0.0, eps=eps, task="multi", reduction="none"))
    ref = _reference(x, jnp.float32(0.0), eps=eps, task="multi", reduction="none")
    assert jnp.allclose(out, ref, rtol=1e-4, atol=1e-5)

    # ragged shape exercising the un-padded tail handling (in-kernel row mask)
    xr = jax.random.normal(kx, (3, 5, 16), dtype=jnp.float32)
    tr = jax.random.uniform(kt, (3, 5, 16), dtype=jnp.float32)
    out = jax.block_until_ready(
        ganetic_loss(xr, tr, eps=eps, task="binary", reduction="mean"))
    ref = _reference(xr, tr, eps=eps, task="binary", reduction="mean")
    assert jnp.allclose(out, ref, rtol=1e-4, atol=1e-5), (out, ref)

    print("KERNEL_OK")
</pallas_src>

<mosaic_0001>
module attributes {stable_mosaic.version = 11 : i64} {
  func.func @_partial_sums_kernel(%arg0: i32, %arg1: i32, %arg2: memref<8x512xf32, #tpu.memory_space<vmem>>, %arg3: memref<1x8x512xf32, #tpu.memory_space<vmem>>, %arg4: memref<1x8x512xf32, #tpu.memory_space<vmem>>) attributes {dimension_semantics = [#tpu.dimension_semantics<parallel>, #tpu.dimension_semantics<arbitrary>], iteration_bounds = array<i64: 1, 1>, scalar_prefetch = 0 : i64, scratch_operands = 0 : i64, tpu.core_type = #tpu.core_type<tc>, window_params = [{transform_indices = @transform_0, window_bounds = array<i64: 8, 512>}, {transform_indices = @transform_1, window_bounds = array<i64: 1, 8, 512>}, {transform_indices = @transform_2, window_bounds = array<i64: 1, 8, 512>}]} {
    %c0_i32 = arith.constant 0 : i32
    %0 = arith.cmpi eq, %arg1, %c0_i32 : i32
    %1 = arith.extui %0 : i1 to i32
    %c0_i32_0 = arith.constant 0 : i32
    %2 = arith.cmpi ne, %1, %c0_i32_0 : i32
    scf.if %2 {
      %cst_5 = arith.constant 0.000000e+00 : f32
      %21 = vector.broadcast %cst_5 : f32 to vector<8x512xf32>
      %c0_6 = arith.constant 0 : index
      %c0_7 = arith.constant 0 : index
      %c0_8 = arith.constant 0 : index
      %22 = vector.load %arg3[%c0_6, %c0_7, %c0_8] : memref<1x8x512xf32, #tpu.memory_space<vmem>>, vector<1x8x512xf32>
      %23 = vector.shape_cast %22 : vector<1x8x512xf32> to vector<8x512xf32>
      %24 = vector.shape_cast %21 : vector<8x512xf32> to vector<1x8x512xf32>
      tpu.vector_store %arg3[%c0_6, %c0_7, %c0_8], %24 {strides = array<i32>} : memref<1x8x512xf32, #tpu.memory_space<vmem>>, vector<1x8x512xf32>,
      %cst_9 = arith.constant 0.000000e+00 : f32
      %25 = vector.broadcast %cst_9 : f32 to vector<8x512xf32>
      %c0_10 = arith.constant 0 : index
      %c0_11 = arith.constant 0 : index
      %c0_12 = arith.constant 0 : index
      %26 = vector.load %arg4[%c0_10, %c0_11, %c0_12] : memref<1x8x512xf32, #tpu.memory_space<vmem>>, vector<1x8x512xf32>
      %27 = vector.shape_cast %26 : vector<1x8x512xf32> to vector<8x512xf32>
      %28 = vector.shape_cast %25 : vector<8x512xf32> to vector<1x8x512xf32>
      tpu.vector_store %arg4[%c0_10, %c0_11, %c0_12], %28 {strides = array<i32>} : memref<1x8x512xf32, #tpu.memory_space<vmem>>, vector<1x8x512xf32>,
    } else {
    }
    %c0 = arith.constant 0 : index
    %c0_1 = arith.constant 0 : index
    %3 = vector.load %arg2[%c0, %c0_1] : memref<8x512xf32, #tpu.memory_space<vmem>>, vector<8x512xf32>
    %4 = arith.negf %3 : vector<8x512xf32>
    %5 = math.exp %4 : vector<8x512xf32>
    %cst = arith.constant 1.000000e+00 : f32
    %6 = vector.broadcast %cst : f32 to vector<8x512xf32>
    %7 = arith.addf %6, %5 : vector<8x512xf32>
    %8 = arith.divf %6, %7 : vector<8x512xf32>
    %9 = arith.mulf %8, %8 : vector<8x512xf32>
    %10 = arith.mulf %9, %8 : vector<8x512xf32>
    %c1_i32 = arith.constant 1 : i32
    %11 = arith.muli %arg0, %c1_i32 : i32
    %12 = arith.addi %11, %arg1 : i32
    %c1_i32_2 = arith.constant 1 : i32
    %13 = arith.addi %12, %c1_i32_2 : i32
    %c8_i32 = arith.constant 8 : i32
    %14 = arith.muli %13, %c8_i32 : i32
    %c4_i32 = arith.constant 4 : i32
    %15 = arith.cmpi sgt, %14, %c4_i32 : i32
    %true = arith.constant true
    %16 = arith.xori %15, %true : i1
    %17 = arith.extui %16 : i1 to i32
    %c0_i32_3 = arith.constant 0 : i32
    %18 = arith.cmpi ne, %17, %c0_i32_3 : i32
    scf.if %18 {
      %c0_5 = arith.constant 0 : index
      %c0_6 = arith.constant 0 : index
      %c0_7 = arith.constant 0 : index
      %21 = vector.load %arg3[%c0_5, %c0_6, %c0_7] : memref<1x8x512xf32, #tpu.memory_space<vmem>>, vector<1x8x512xf32>
      %22 = vector.shape_cast %21 : vector<1x8x512xf32> to vector<8x512xf32>
      %23 = vector.shape_cast %8 : vector<8x512xf32> to vector<1x8x512xf32>
      %cst_8 = arith.constant dense<0.000000e+00> : vector<8x512xf32>
      %24 = vector.multi_reduction <add>, %23, %cst_8 [0] : vector<1x8x512xf32> to vector<8x512xf32>
      %25 = arith.addf %22, %24 : vector<8x512xf32>
      %c0_9 = arith.constant 0 : index
      %c0_10 = arith.constant 0 : index
      %c0_11 = arith.constant 0 : index
      %26 = vector.load %arg3[%c0_9, %c0_10, %c0_11] : memref<1x8x512xf32, #tpu.memory_space<vmem>>, vector<1x8x512xf32>
      %27 = vector.shape_cast %26 : vector<1x8x512xf32> to vector<8x512xf32>
      %28 = vector.shape_cast %25 : vector<8x512xf32> to vector<1x8x512xf32>
      tpu.vector_store %arg3[%c0_9, %c0_10, %c0_11], %28 {strides = array<i32>} : memref<1x8x512xf32, #tpu.memory_space<vmem>>, vector<1x8x512xf32>,
      %c0_12 = arith.constant 0 : index
      %c0_13 = arith.constant 0 : index
      %c0_14 = arith.constant 0 : index
      %29 = vector.load %arg4[%c0_12, %c0_13, %c0_14] : memref<1x8x512xf32, #tpu.memory_space<vmem>>, vector<1x8x512xf32>
      %30 = vector.shape_cast %29 : vector<1x8x512xf32> to vector<8x512xf32>
      %31 = vector.shape_cast %10 : vector<8x512xf32> to vector<1x8x512xf32>
      %cst_15 = arith.constant dense<0.000000e+00> : vector<8x512xf32>
      %32 = vector.multi_reduction <add>, %31, %cst_15 [0] : vector<1x8x512xf32> to vector<8x512xf32>
      %33 = arith.addf %30, %32 : vector<8x512xf32>
      %c0_16 = arith.constant 0 : index
      %c0_17 = arith.constant 0 : index
      %c0_18 = arith.constant 0 : index
      %34 = vector.load %arg4[%c0_16, %c0_17, %c0_18] : memref<1x8x512xf32, #tpu.memory_space<vmem>>, vector<1x8x512xf32>
      %35 = vector.shape_cast %34 : vector<1x8x512xf32> to vector<8x512xf32>
      %36 = vector.shape_cast %33 : vector<8x512xf32> to vector<1x8x512xf32>
      tpu.vector_store %arg4[%c0_16, %c0_17, %c0_18], %36 {strides = array<i32>} : memref<1x8x512xf32, #tpu.memory_space<vmem>>, vector<1x8x512xf32>,
    } else {
    }
    %19 = arith.extui %15 : i1 to i32
    %c0_i32_4 = arith.constant 0 : i32
    %20 = arith.cmpi ne, %19, %c0_i32_4 : i32
    scf.if %20 {
      %21 = tpu.iota {dimensions = array<i32: 0>} : vector<8x1xi32>
      %c8_i32_5 = arith.constant 8 : i32
      %22 = arith.muli %12, %c8_i32_5 : i32
      %23 = vector.broadcast %22 : i32 to vector<8x1xi32>
      %24 = arith.addi %21, %23 : vector<8x1xi32>
      %c4_i32_6 = arith.constant 4 : i32
      %25 = vector.broadcast %c4_i32_6 : i32 to vector<8x1xi32>
      %26 = arith.cmpi slt, %24, %25 : vector<8x1xi32>
      %cst_7 = arith.constant 0.000000e+00 : f32
      %27 = vector.shape_cast %26 : vector<8x1xi1> to vector<8x1xi1>
      %28 = vector.broadcast %27 : vector<8x1xi1> to vector<8x512xi1>
      %29 = vector.broadcast %cst_7 : f32 to vector<8x512xf32>
      %30 = arith.select %28, %8, %29 : vector<8x512xi1>, vector<8x512xf32>
      %c0_8 = arith.constant 0 : index
      %c0_9 = arith.constant 0 : index
      %c0_10 = arith.constant 0 : index
      %31 = vector.load %arg3[%c0_8, %c0_9, %c0_10] : memref<1x8x512xf32, #tpu.memory_space<vmem>>, vector<1x8x512xf32>
      %32 = vector.shape_cast %31 : vector<1x8x512xf32> to vector<8x512xf32>
      %33 = vector.shape_cast %30 : vector<8x512xf32> to vector<1x8x512xf32>
      %cst_11 = arith.constant dense<0.000000e+00> : vector<8x512xf32>
      %34 = vector.multi_reduction <add>, %33, %cst_11 [0] : vector<1x8x512xf32> to vector<8x512xf32>
      %35 = arith.addf %32, %34 : vector<8x512xf32>
      %c0_12 = arith.constant 0 : index
      %c0_13 = arith.constant 0 : index
      %c0_14 = arith.constant 0 : index
      %36 = vector.load %arg3[%c0_12, %c0_13, %c0_14] : memref<1x8x512xf32, #tpu.memory_space<vmem>>, vector<1x8x512xf32>
      %37 = vector.shape_cast %36 : vector<1x8x512xf32> to vector<8x512xf32>
      %38 = vector.shape_cast %35 : vector<8x512xf32> to vector<1x8x512xf32>
      tpu.vector_store %arg3[%c0_12, %c0_13, %c0_14], %38 {strides = array<i32>} : memref<1x8x512xf32, #tpu.memory_space<vmem>>, vector<1x8x512xf32>,
      %cst_15 = arith.constant 0.000000e+00 : f32
      %39 = vector.shape_cast %26 : vector<8x1xi1> to vector<8x1xi1>
      %40 = vector.broadcast %39 : vector<8x1xi1> to vector<8x512xi1>
      %41 = vector.broadcast %cst_15 : f32 to vector<8x512xf32>
      %42 = arith.select %40, %10, %41 : vector<8x512xi1>, vector<8x512xf32>
      %c0_16 = arith.constant 0 : index
      %c0_17 = arith.constant 0 : index
      %c0_18 = arith.constant 0 : index
      %43 = vector.load %arg4[%c0_16, %c0_17, %c0_18] : memref<1x8x512xf32, #tpu.memory_space<vmem>>, vector<1x8x512xf32>
      %44 = vector.shape_cast %43 : vector<1x8x512xf32> to vector<8x512xf32>
      %45 = vector.shape_cast %42 : vector<8x512xf32> to vector<1x8x512xf32>
      %cst_19 = arith.constant dense<0.000000e+00> : vector<8x512xf32>
      %46 = vector.multi_reduction <add>, %45, %cst_19 [0] : vector<1x8x512xf32> to vector<8x512xf32>
      %47 = arith.addf %44, %46 : vector<8x512xf32>
      %c0_20 = arith.constant 0 : index
      %c0_21 = arith.constant 0 : index
      %c0_22 = arith.constant 0 : index
      %48 = vector.load %arg4[%c0_20, %c0_21, %c0_22] : memref<1x8x512xf32, #tpu.memory_space<vmem>>, vector<1x8x512xf32>
      %49 = vector.shape_cast %48 : vector<1x8x512xf32> to vector<8x512xf32>
      %50 = vector.shape_cast %47 : vector<8x512xf32> to vector<1x8x512xf32>
      tpu.vector_store %arg4[%c0_20, %c0_21, %c0_22], %50 {strides = array<i32>} : memref<1x8x512xf32, #tpu.memory_space<vmem>>, vector<1x8x512xf32>,
    } else {
    }
    return
  }
  func.func @transform_0(%arg0: i32, %arg1: i32) -> (i32, i32) {
    %c1_i32 = arith.constant 1 : i32
    %0 = arith.muli %arg0, %c1_i32 : i32
    %1 = arith.addi %0, %arg1 : i32
    %c0_i32 = arith.constant 0 : i32
    %2 = arith.minsi %1, %c0_i32 : i32
    %c0_i32_0 = arith.constant 0 : i32
    %c0_i32_1 = arith.constant 0 : i32
    return %2, %c0_i32_0 : i32, i32
  }
  func.func @transform_1(%arg0: i32, %arg1: i32) -> (i32, i32, i32) {
    %c0_i32 = arith.constant 0 : i32
    %c0_i32_0 = arith.constant 0 : i32
    %c0_i32_1 = arith.constant 0 : i32
    return %arg0, %c0_i32, %c0_i32_0 : i32, i32, i32
  }
  func.func @transform_2(%arg0: i32, %arg1: i32) -> (i32, i32, i32) {
    %c0_i32 = arith.constant 0 : i32
    %c0_i32_0 = arith.constant 0 : i32
    %c0_i32_1 = arith.constant 0 : i32
    return %arg0, %c0_i32, %c0_i32_0 : i32, i32, i32
  }
}

</mosaic_0001>

<bundles_post_ra>
// kernel: tpu_custom_call.1
= control target key start
LH: loop header
LB: loop body
LE: loop exit
PB: predicated region body
PF: predicated region fallthrough
CT: control target
= control target key end

     0   :  { %8 = vsyncpa [#allocation3], 0  ;;  %s525_s0 = inlined_call_operand.hbm [shape: f32[4,512], index: 0, kind: input, shape index: {}]   ;;  %s526_s1 = inlined_call_operand.hbm [shape: f32[1,8,512], index: 1, kind: output, shape index: {0}]   ;;  %s527_s2 = inlined_call_operand.hbm [shape: f32[1,8,512], index: 2, kind: output, shape index: {1}]  }
   0x1   :  { %9 = vsyncpa [#allocation4], 0 }
   0x2   :  { %10 = vsyncpa [#allocation7], 0 }
   0x3   :  { %22 = vsyncadd [#allocation3], 256  ;;  %s28_s11 = sshll.u32 %s525_s0, 4  ;;  %s454_s12 = smov [#allocation2]   ;;  %s29_s11 = int_to_ptr.hbm [resolvable:$true] %s28_s11 }
   0x4   :  { %s30_s13 = sshll.u32 %s454_s12, 4  ;;  %s455_s14 = smov 256   ;;  %s31_s13 = int_to_ptr.vmem [resolvable:$true] %s30_s13 }
   0x5   :  { %s456_s15 = smov 16  }
   0x6   :  { %36 = dma.hbm_to_vmem [thread:$0]  %s29_s11, 256, %s31_s13, [#allocation3], %s455_s14, %s455_s14, %s456_s15  }
   0x7   :  { %448 = dma.done.wait [#allocation3], 512  }
   0x8   :  { %449 = vsyncadd [#allocation3], 4294966784  ;;  %v60_v0 = vld [vmem:[#allocation2] sm:$0xff]  ;;  %v62_v1 = vld [vmem:[#allocation2 + $0x10] sm:$0xff]  ;;  %v229_v48 = vlaneseq  ;;  %s457_s0 = smov [#allocation5]   ;;  %s322_s19 = sshll.u32 %s526_s1, 4  ;;  %s323_s19 = int_to_ptr.hbm [resolvable:$true] %s322_s19 }
   0x9   :  { %v61_v2 = vld [vmem:[#allocation2 + $0x8] sm:$0xff]  ;;  %v350_v3 = vmul.f32 -1.442695, %v60_v0  ;;  %v352_v4 = vmul.f32 -1.442695, %v62_v1  ;;  %v63_v6 = vld [vmem:[#allocation2 + $0x18] sm:$0xff] }
   0xa   :  { %v351_v5 = vmul.f32 -1.442695, %v61_v2  ;;  %v353_v7 = vmul.f32 -1.442695, %v63_v6  ;;  %v230_v61 = vshrl.u32 %v229_v48, 7  ;;  %s320_s16 = sshll.u32 %s457_s0, 4  ;;  %s321_s16 = int_to_ptr.vmem [resolvable:$true] %s320_s16 }
   0xb   :  { %360 = vpow2.f32 %v350_v3  ;;  %s458_s20 = smov [#allocation6]   ;;  %s333_s23 = sshll.u32 %s527_s2, 4  ;;  %s334_s23 = int_to_ptr.hbm [resolvable:$true] %s333_s23 }
   0xc   :  { %362 = vpow2.f32 %v352_v4  ;;  %s331_s21 = sshll.u32 %s458_s20, 4  ;;  %s332_s21 = int_to_ptr.vmem [resolvable:$true] %s331_s21 }
   0xd   :  { %364 = vpow2.f32 %v351_v5 }
   0xe   :  { %366 = vpow2.f32 %v353_v7 }
  0x11   :  { %v361_v8 = vpop.eup %360 }
  0x12   :  { %v363_v9 = vpop.eup %362  ;;  %v76_v10 = vadd.f32 1.0, %v361_v8 }
  0x13   :  { %v365_v11 = vpop.eup %364  ;;  %v78_v12 = vadd.f32 1.0, %v363_v9 }
  0x14   :  { %v367_v13 = vpop.eup %366  ;;  %368 = vrcp.f32 %v76_v10  ;;  %v77_v14 = vadd.f32 1.0, %v365_v11  ;;  %v89_v16 = vand.u32 2147483647, %v76_v10  ;;  %v91_v17 = vand.u32 2147483648, %v76_v10 }
  0x15   :  { %370 = vrcp.f32 %v78_v12  ;;  %v79_v15 = vadd.f32 1.0, %v367_v13  ;;  %v119_v19 = vand.u32 2147483647, %v78_v12  ;;  %v121_v20 = vand.u32 2147483648, %v78_v12 }
  0x16   :  { %372 = vrcp.f32 %v77_v14  ;;  %vm85_vm0 = vweird.f32 %v76_v10  ;;  %vm115_vm1 = vweird.f32 %v78_v12  ;;  %vm477_vm3 = vcmp.eq.f32.partialorder %v89_v16, 8.507059e+37 }
  0x17   :  { %374 = vrcp.f32 %v79_v15  ;;  %v92_v26 = vor.u32 1.1754944e-38, %v91_v17  ;;  %vm481_vm5 = vcmp.eq.f32.partialorder %v119_v19, 8.507059e+37  ;;  %v122_v30 = vor.u32 1.1754944e-38, %v121_v20 }
  0x18   :  { %vm100_vm6 = vweird.f32 %v77_v14  ;;  %v104_v34 = vand.u32 2147483647, %v77_v14  ;;  %v106_v37 = vand.u32 2147483648, %v77_v14  ;;  %vm130_vm8 = vweird.f32 %v79_v15 }
  0x19   :  { %v136_v42 = vand.u32 2147483648, %v79_v15  ;;  %v134_v45 = vand.u32 2147483647, %v79_v15 }
  0x1a   :  { %v369_v18 = vpop.eup %368  ;;  %v107_v52 = vor.u32 1.1754944e-38, %v106_v37  ;;  %vm105_vm13 = vcmp.eq.f32.partialorder %v104_v34, 8.507059e+37 }
  0x1b   :  { %v371_v21 = vpop.eup %370  ;;  %v81_v22 = vmul.f32 %v369_v18, %v76_v10  ;;  %vm86_vm2 = vweird.f32 %v369_v18  ;;  %v137_v56 = vor.u32 1.1754944e-38, %v136_v42  ;;  %vm135_vm15 = vcmp.eq.f32.partialorder %v134_v45, 8.507059e+37 }
  0x1c   :  { %v111_v23 = vmul.f32 %v371_v21, %v78_v12  ;;  %v373_v27 = vpop.eup %372  ;;  %vm116_vm4 = vweird.f32 %v371_v21  ;;  %vm486_vm7 = vmor %vm85_vm0, %vm86_vm2  ;;  %vm234_vm0 = vcmp.lt.s32.totalorder %v230_v61, 4 }
  0x1d   :  { %v82_v24 = vsub.f32 1.0, %v81_v22  ;;  %v375_v31 = vpop.eup %374  ;;  %v96_v33 = vmul.f32 %v373_v27, %v77_v14  ;;  %vm491_vm9 = vmor %vm115_vm1, %vm116_vm4  ;;  %vm101_vm10 = vweird.f32 %v373_v27 }
  0x1e   :  { %v112_v28 = vsub.f32 1.0, %v111_v23  ;;  %v126_v38 = vmul.f32 %v375_v31, %v79_v15  ;;  %vm131_vm11 = vweird.f32 %v375_v31  ;;  %vm502_vm12 = vmor %vm100_vm6, %vm101_vm10 }
  0x1f   :  { %v83_v32 = vmul.f32 %v369_v18, %v82_v24  ;;  %v97_v41 = vsub.f32 1.0, %v96_v33  ;;  %vm132_vm14 = vmor %vm130_vm8, %vm131_vm11 }
  0x20   :  { %v113_v36 = vmul.f32 %v371_v21, %v112_v28  ;;  %v127_v44 = vsub.f32 1.0, %v126_v38 }
  0x21   :  { %v84_v39 = vadd.f32 %v369_v18, %v83_v32  ;;  %v98_v47 = vmul.f32 %v373_v27, %v97_v41 }
  0x22   :  { %v114_v43 = vadd.f32 %v371_v21, %v113_v36  ;;  %v128_v53 = vmul.f32 %v375_v31, %v127_v44 }
  0x23   :  { %v88_v46 = vsel %vm486_vm7, %v369_v18, %v84_v39  ;;  %v99_v55 = vadd.f32 %v373_v27, %v98_v47 }
  0x24   :  { %v93_v49 = vsel %vm477_vm3, %v92_v26, %v88_v46  ;;  %v118_v50 = vsel %vm491_vm9, %v371_v21, %v114_v43  ;;  %v129_v58 = vadd.f32 %v375_v31, %v128_v53 }
  0x25   :  { %241 = vst [vmem:[#allocation1] ss:$2 sm:$0xff] %v93_v49  ;;  %v123_v54 = vsel %vm481_vm5, %v122_v30, %v118_v50  ;;  %v140_v57 = vmul.f32 %v93_v49, %v93_v49  ;;  %v103_v60 = vsel %vm502_vm12, %v373_v27, %v99_v55 }
  0x26   :  { %243 = vst [vmem:[#allocation1 + $0x1] ss:$2 sm:$0xff] %v123_v54  ;;  %v142_v59 = vmul.f32 %v123_v54, %v123_v54  ;;  %v108_v62 = vsel %vm105_vm13, %v107_v52, %v103_v60  ;;  %v133_v63 = vsel %vm132_vm14, %v375_v31, %v129_v58 }
  0x27   :  { %245 = vst [vmem:[#allocation1 + $0x10] ss:$2 sm:$0xff] %v108_v62  ;;  %v138_v0 = vsel %vm135_vm15, %v137_v56, %v133_v63  ;;  %v144_v1 = vmul.f32 %v140_v57, %v93_v49  ;;  %v141_v2 = vmul.f32 %v108_v62, %v108_v62 }
  0x28   :  { %247 = vst [vmem:[#allocation1 + $0x11] ss:$2 sm:$0xff] %v138_v0  ;;  %v146_v3 = vmul.f32 %v142_v59, %v123_v54  ;;  %v143_v4 = vmul.f32 %v138_v0, %v138_v0 }
  0x29   :  { %v145_v7 = vmul.f32 %v141_v2, %v108_v62 }
  0x2a   :  { %v147_v10 = vmul.f32 %v143_v4, %v138_v0 }
  0x2d   :  { %v248_v5 = vld.sshfl [vmem:[#allocation1] sm:$0xff pattern:$0x75316420]  ;;  %v249_v6 = vld.sshfl [vmem:[#allocation1 + $0x8] sm:$0xff pattern:$0x75316420] }
  0x2e   :  { %280 = vst [vmem:[#allocation1] ss:$2 sm:$0xff] %v144_v1  ;;  %v256_v8 = vsel %vm234_vm0, %v248_v5, 0.0  ;;  %v257_v9 = vsel %vm234_vm0, %v249_v6, 0.0 }
  0x2f   :  { %282 = vst [vmem:[#allocation1 + $0x1] ss:$2 sm:$0xff] %v146_v3  ;;  %v250_v11 = vld.sshfl [vmem:[#allocation1 + $0x10] sm:$0xff pattern:$0x75316420] }
  0x30   :  { %v251_v12 = vld.sshfl [vmem:[#allocation1 + $0x18] sm:$0xff pattern:$0x75316420]  ;;  %v258_v13 = vsel %vm234_vm0, %v250_v11, 0.0  ;;  %272 = vst [vmem:[#allocation5] sm:$0xff] %v256_v8 }
  0x31   :  { %284 = vst [vmem:[#allocation1 + $0x10] ss:$2 sm:$0xff] %v145_v7  ;;  %v259_v14 = vsel %vm234_vm0, %v251_v12, 0.0 }
  0x32   :  { %286 = vst [vmem:[#allocation1 + $0x11] ss:$2 sm:$0xff] %v147_v10 }
  0x33   :  { %273 = vst [vmem:[#allocation5 + $0x8] sm:$0xff] %v257_v9 }
  0x34   :  { %274 = vst [vmem:[#allocation5 + $0x10] sm:$0xff] %v258_v13 }
  0x35   :  { %275 = vst [vmem:[#allocation5 + $0x18] sm:$0xff] %v259_v14 }
  0x36   :  { %v287_v15 = vld.sshfl [vmem:[#allocation1] sm:$0xff pattern:$0x75316420]  ;;  %v288_v17 = vld.sshfl [vmem:[#allocation1 + $0x8] sm:$0xff pattern:$0x75316420] }
  0x37   :  { %v295_v16 = vsel %vm234_vm0, %v287_v15, 0.0  ;;  %v296_v18 = vsel %vm234_vm0, %v288_v17, 0.0  ;;  %325 = dma.vmem_to_hbm [thread:$0]  %s321_s16, 512, %s323_s19, [#allocation4]  }
  0x38   :  { %311 = vst [vmem:[#allocation6] sm:$0xff] %v295_v16 }
  0x39   :  { %v289_v19 = vld.sshfl [vmem:[#allocation1 + $0x10] sm:$0xff pattern:$0x75316420]  ;;  %312 = vst [vmem:[#allocation6 + $0x8] sm:$0xff] %v296_v18 }
  0x3a   :  { %v297_v20 = vsel %vm234_vm0, %v289_v19, 0.0  ;;  %v290_v21 = vld.sshfl [vmem:[#allocation1 + $0x18] sm:$0xff pattern:$0x75316420] }
  0x3b   :  { %v298_v22 = vsel %vm234_vm0, %v290_v21, 0.0  ;;  %313 = vst [vmem:[#allocation6 + $0x10] sm:$0xff] %v297_v20 }
  0x3c   :  { %314 = vst [vmem:[#allocation6 + $0x18] sm:$0xff] %v298_v22 }
  0x3d   :  { %336 = dma.vmem_to_hbm [thread:$0]  %s332_s21, 512, %s334_s23, [#allocation7]  }
  0x3e   :  { %450 = dma.done.wait [#allocation4], 512  }
  0x3f   :  { %451 = vsyncadd [#allocation4], 4294966784 }
  0x40   :  { %452 = dma.done.wait [#allocation7], 512  }
  0x41   :  { %453 = vsyncadd [#allocation7], 4294966784 }
  0x42   :  { %345 = vsyncpa [#allocation3], 1 }
  0x43   :  { %346 = vsyncpa [#allocation4], 1 }
  0x44   :  { %347 = vsyncpa [#allocation7], 1 }

</bundles_post_ra>
